<compile_context>
chip_gen: v5e
topology: v5e:2x2
jax: 0.10.0
libtpu: 0.0.40
codegen_flags: <defaults>
</compile_context>

<pallas_src>
import jax
import jax.numpy as jnp
from jax.experimental import pallas as pl
from jax.experimental.pallas import tpu as pltpu

_MiB = 1024 * 1024


# --------------------------------------------------------------------------------------
# VMEM budgeting helpers
# --------------------------------------------------------------------------------------
def _vmem_capacity_bytes(default=64 * _MiB):
    """Physical VMEM per core; conservative (v7x-sized) default if the query fails."""
    try:
        info = pltpu.get_tpu_info()
        cap = getattr(info, "vmem_capacity_bytes", None)
        if cap:
            return int(cap)
    except Exception:
        pass
    return default


def _vmem_budget(itemsize):
    """Returns (physical_cap, usable_steady_state, per_block_factor, target_block, block_cap)."""
    cap = _vmem_capacity_bytes()
    # Steady-state scoped-VMEM we are willing to use (leave headroom for Mosaic's
    # internal scratch / layout temps): v5e/v6e (128 MiB phys) -> 64 MiB, v7x -> ~38 MiB.
    usable = min(int(cap * 0.6), 64 * _MiB)
    # Per-block multiplier: double-buffered in + out blocks (4x) plus the f32 upcast
    # temp the mean reduce may materialize for sub-32-bit x (~4/itemsize x block).
    factor = 4 + max(1, 4 // itemsize)
    # Target block size: big enough that the ~0.35 us per-grid-step overhead is <10% of
    # the block's HBM time even at v7x's 3.2 TB/s; v5e/v6e amortize already at 4 MiB.
    target = 6 * _MiB if cap < 96 * _MiB else 4 * _MiB
    block_cap = max(usable // factor, 512 * 1024)
    return cap, usable, factor, target, block_cap


def _vmem_limit_for_block(block_bytes, itemsize, extra_bytes, cap):
    """Explicit vmem_limit_bytes for a given data block: 2x double-buffered in + out,
    f32 reduce temp, weights/gates, plus headroom; clamped under physical VMEM."""
    upcast_temp = block_bytes * max(1, 4 // itemsize)
    limit = 4 * block_bytes + upcast_temp + extra_bytes + 2 * _MiB
    return max(8 * _MiB, min(limit, int(cap * 0.9)))


def _pick_block_batch(B, per_batch_bytes, target_bytes, block_cap_bytes):
    """Largest divisor of B near target_bytes per block, capped by block_cap_bytes,
    keeping >= 4 grid steps (>= 2 per v7x TensorCore) whenever B allows.
    Returns None if even a single image busts the cap (caller switches to two-pass)."""
    if per_batch_bytes > block_cap_bytes:
        return None
    min_steps = 4 if B >= 4 else max(B, 1)
    max_bt = max(1, B // min_steps)
    best = 1
    for bt in range(1, max_bt + 1):
        if B % bt:
            continue
        if bt * per_batch_bytes > block_cap_bytes:
            break
        best = bt
        if bt * per_batch_bytes >= target_bytes:
            break
    return best


# --------------------------------------------------------------------------------------
# Single-pass (fused) kernel: whole (Bt, C, HW) slab resident per grid step
# --------------------------------------------------------------------------------------
def _se_fused_kernel(x_ref, w1t_ref, w2t_ref, o_ref):
    # x_ref: (Bt, C, HW)   w1t_ref: (C, Cr)   w2t_ref: (Cr, C)   o_ref: (Bt, C, HW)
    x = x_ref[...]                                                    # native dtype
    # Squeeze: global average pool over the flattened spatial (lane) axis, f32 accumulate.
    y = jnp.mean(x, axis=-1, dtype=jnp.float32)                       # (Bt, C)
    # Excitation: Linear -> ReLU -> Linear -> Sigmoid (bias-free), all f32.  These tiny
    # matmuls occupy a corner of the MXU and are fully hidden under the input DMA.
    h = jnp.maximum(jnp.dot(y, w1t_ref[...], preferred_element_type=jnp.float32), 0.0)
    s = jax.nn.sigmoid(jnp.dot(h, w2t_ref[...], preferred_element_type=jnp.float32))
    # Scale: per-channel gate broadcast over the spatial axis, in native dtype.
    o_ref[...] = x * s.astype(x.dtype)[:, :, None]


def _se_single_pass(xf, w1t, w2t, Bt, vmem_limit, donate_x):
    B, C, HW = xf.shape
    Cr = w1t.shape[1]
    itemsize = jnp.dtype(xf.dtype).itemsize
    cost = pl.CostEstimate(
        flops=2 * B * C * HW + 4 * B * C * Cr,               # mean + scale + 2 matmuls
        transcendentals=B * C,                               # sigmoid
        bytes_accessed=2 * B * C * HW * itemsize + 2 * C * Cr * 4,
    )
    return pl.pallas_call(
        _se_fused_kernel,
        out_shape=jax.ShapeDtypeStruct((B, C, HW), xf.dtype),
        grid_spec=pltpu.PrefetchScalarGridSpec(
            num_scalar_prefetch=0,
            grid=(B // Bt,),
            in_specs=[
                pl.BlockSpec((Bt, C, HW), lambda b: (b, 0, 0)),
                pl.BlockSpec((C, Cr), lambda b: (0, 0)),
                pl.BlockSpec((Cr, C), lambda b: (0, 0)),
            ],
            out_specs=pl.BlockSpec((Bt, C, HW), lambda b: (b, 0, 0)),
        ),
        compiler_params=pltpu.CompilerParams(
            dimension_semantics=("parallel",),
            vmem_limit_bytes=vmem_limit,
        ),
        cost_estimate=cost,
        input_output_aliases=({0: 0} if donate_x else {}),
    )(xf, w1t, w2t)


# --------------------------------------------------------------------------------------
# Two-pass spatially tiled fallback (large C*HW images, esp. v7x 64 MiB VMEM)
# --------------------------------------------------------------------------------------
def _se_two_pass(xf, w1t, w2t, spatial_block, block_cap, weights_bytes, cap,
                 itemsize, donate_x):
    B, C, HW = xf.shape
    Cr = w1t.shape[1]

    if spatial_block is None:
        hw_tile = max(128, (block_cap // (C * itemsize)) // 128 * 128)
    else:
        hw_tile = spatial_block                     # must be a multiple of 128 (or >= HW)
    if hw_tile >= HW or HW <= 128:
        hw_tile = HW                                # degenerate: single spatial tile
    # TODO(synk): if C is so large that even (C, 128) busts the budget, also tile C.
    n_t = pl.cdiv(HW, hw_tile)
    needs_mask = (HW % hw_tile) != 0

    block_bytes = C * hw_tile * itemsize
    vmem_limit = _vmem_limit_for_block(block_bytes, itemsize, weights_bytes, cap)

    # -- Pass 1: spatially tiled partial-sum reduce + tiny excitation -> gates (B, C, 1)
    def gate_kernel(x_ref, w1t_ref, w2t_ref, s_ref, acc_ref):
        t = pl.program_id(1)

        @pl.when(t == 0)
        def _init():
            acc_ref[...] = jnp.zeros_like(acc_ref)

        x = x_ref[...]                                             # (1, C, hw_tile)
        if needs_mask:
            col = t * hw_tile + jax.lax.broadcasted_iota(jnp.int32, x.shape, 2)
            x = jnp.where(col < HW, x, jnp.zeros_like(x))
        acc_ref[...] += jnp.sum(x, axis=-1, dtype=jnp.float32)      # (1, C)

        @pl.when(t == pl.num_programs(1) - 1)
        def _finalize():
            y = acc_ref[...] * jnp.float32(1.0 / HW)
            h = jnp.maximum(
                jnp.dot(y, w1t_ref[...], preferred_element_type=jnp.float32), 0.0)
            s = jax.nn.sigmoid(
                jnp.dot(h, w2t_ref[...], preferred_element_type=jnp.float32))
            s_ref[...] = s[:, :, None]

    gates = pl.pallas_call(
        gate_kernel,
        out_shape=jax.ShapeDtypeStruct((B, C, 1), jnp.float32),
        grid_spec=pltpu.PrefetchScalarGridSpec(
            num_scalar_prefetch=0,
            grid=(B, n_t),
            in_specs=[
                pl.BlockSpec((1, C, hw_tile), lambda b, t: (b, 0, t)),
                pl.BlockSpec((C, Cr), lambda b, t: (0, 0)),
                pl.BlockSpec((Cr, C), lambda b, t: (0, 0)),
            ],
            out_specs=pl.BlockSpec((1, C, 1), lambda b, t: (b, 0, 0)),
            scratch_shapes=[pltpu.VMEM((1, C), jnp.float32)],
        ),
        compiler_params=pltpu.CompilerParams(
            dimension_semantics=("parallel", "arbitrary"),
            vmem_limit_bytes=vmem_limit,
        ),
        cost_estimate=pl.CostEstimate(
            flops=B * C * HW + 4 * B * C * Cr,
            transcendentals=B * C,
            bytes_accessed=B * C * HW * itemsize + B * C * 4 + 2 * C * Cr * 4,
        ),
    )(xf, w1t, w2t)

    # -- Pass 2: spatially tiled per-channel rescale
    def scale_kernel(x_ref, s_ref, o_ref):
        o_ref[...] = x_ref[...] * s_ref[...].astype(x_ref.dtype)   # (1,C,1) broadcast

    out = pl.pallas_call(
        scale_kernel,
        out_shape=jax.ShapeDtypeStruct((B, C, HW), xf.dtype),
        grid_spec=pltpu.PrefetchScalarGridSpec(
            num_scalar_prefetch=0,
            grid=(B, n_t),
            in_specs=[
                pl.BlockSpec((1, C, hw_tile), lambda b, t: (b, 0, t)),
                pl.BlockSpec((1, C, 1), lambda b, t: (b, 0, 0)),
            ],
            out_specs=pl.BlockSpec((1, C, hw_tile), lambda b, t: (b, 0, t)),
        ),
        compiler_params=pltpu.CompilerParams(
            dimension_semantics=("parallel", "parallel"),
            vmem_limit_bytes=vmem_limit,
        ),
        cost_estimate=pl.CostEstimate(
            flops=B * C * HW,
            transcendentals=0,
            bytes_accessed=2 * B * C * HW * itemsize + B * C * 4,
        ),
        input_output_aliases=({0: 0} if donate_x else {}),
    )(xf, gates)
    return out


# --------------------------------------------------------------------------------------
# Public wrapper
# --------------------------------------------------------------------------------------
def se_attention(x, w1, w2, *, block_batch=None, force_two_pass=False,
                 spatial_block=None, donate_x=False):
    """x: (B, C, H, W). w1: (C//r, C). w2: (C, C//r). Returns (B, C, H, W)."""
    B, C, H, W = x.shape
    Cr = w1.shape[0]
    assert w1.shape == (Cr, C) and w2.shape == (C, Cr)
    HW = H * W

    # Free layout plumbing at the XLA level (contiguous NCHW -> (B, C, H*W)).
    xf = x.reshape(B, C, HW)
    w1t = w1.T                        # (C, Cr)
    w2t = w2.T                        # (Cr, C)

    itemsize = jnp.dtype(x.dtype).itemsize
    cap, _usable, _factor, target, block_cap = _vmem_budget(itemsize)
    per_batch_bytes = C * HW * itemsize
    weights_bytes = 4 * C * Cr * 4    # both weight tiles, double-buffered, f32

    if block_batch is not None:
        Bt = block_batch
    elif force_two_pass:
        Bt = None
    else:
        Bt = _pick_block_batch(B, per_batch_bytes, target, block_cap)

    if Bt is not None:
        assert B % Bt == 0
        vmem_limit = _vmem_limit_for_block(Bt * per_batch_bytes, itemsize,
                                           weights_bytes, cap)
        out = _se_single_pass(xf, w1t, w2t, Bt, vmem_limit, donate_x)
    else:
        out = _se_two_pass(xf, w1t, w2t, spatial_block, block_cap, weights_bytes,
                           cap, itemsize, donate_x)
    return out.reshape(B, C, H, W)


def se_attention_ref(x, w1, w2):
    # Pure-JAX reference of the PyTorch forward pass.
    y = jnp.mean(x, axis=(2, 3))                     # (B, C)
    h = jnp.maximum(y @ w1.T, 0.0)                   # (B, C//r)
    s = jax.nn.sigmoid(h @ w2.T)                     # (B, C)
    return x * s[:, :, None, None]


if __name__ == "__main__":
    # Small shapes consistent with the module: channel=32, reduction=4.
    B, C, H, W = 2, 32, 16, 16
    reduction = 4
    Cr = C // reduction

    key = jax.random.PRNGKey(0)
    kx, k1, k2 = jax.random.split(key, 3)
    x = jax.random.normal(kx, (B, C, H, W), dtype=jnp.float32)
    # Deterministic weights, std=0.001 (as in init_weights for nn.Linear), no bias.
    w1 = 0.001 * jax.random.normal(k1, (Cr, C), dtype=jnp.float32)
    w2 = 0.001 * jax.random.normal(k2, (C, Cr), dtype=jnp.float32)

    ref = se_attention_ref(x, w1, w2)

    # Default (fused single-pass) path.
    out = jax.block_until_ready(se_attention(x, w1, w2))
    assert out.shape == (B, C, H, W)
    assert jnp.allclose(out, ref, atol=1e-5, rtol=1e-5), "single-pass mismatch vs reference"

    # Exercise the spatially tiled two-pass fallback (used when one image's (C, H*W)
    # slab would not fit the per-block VMEM budget, e.g. large feature maps on v7x).
    out2 = jax.block_until_ready(
        se_attention(x, w1, w2, force_two_pass=True, spatial_block=128))
    assert jnp.allclose(out2, ref, atol=1e-5, rtol=1e-5), "two-pass mismatch vs reference"

    print("KERNEL_OK")
</pallas_src>

<mosaic_0001>
module attributes {stable_mosaic.version = 11 : i64} {
  func.func @_se_fused_kernel(%arg0: i32, %arg1: memref<1x32x256xf32, #tpu.memory_space<vmem>>, %arg2: memref<32x8xf32, #tpu.memory_space<vmem>>, %arg3: memref<8x32xf32, #tpu.memory_space<vmem>>, %arg4: memref<1x32x256xf32, #tpu.memory_space<vmem>>) attributes {dimension_semantics = [#tpu.dimension_semantics<parallel>], iteration_bounds = array<i64: 2>, scalar_prefetch = 0 : i64, scratch_operands = 0 : i64, tpu.core_type = #tpu.core_type<tc>, window_params = [{transform_indices = @transform_0, window_bounds = array<i64: 1, 32, 256>}, {pipeline_mode = #tpu.pipeline_mode<synchronous>, transform_indices = @transform_1, window_bounds = array<i64: 32, 8>}, {pipeline_mode = #tpu.pipeline_mode<synchronous>, transform_indices = @transform_2, window_bounds = array<i64: 8, 32>}, {transform_indices = @transform_3, window_bounds = array<i64: 1, 32, 256>}]} {
    %c0 = arith.constant 0 : index
    %c0_0 = arith.constant 0 : index
    %c0_1 = arith.constant 0 : index
    %0 = vector.load %arg1[%c0, %c0_0, %c0_1] : memref<1x32x256xf32, #tpu.memory_space<vmem>>, vector<1x32x256xf32>
    %cst = arith.constant dense<0.000000e+00> : vector<1x32xf32>
    %1 = vector.multi_reduction <add>, %0, %cst [2] : vector<1x32x256xf32> to vector<1x32xf32>
    %cst_2 = arith.constant 2.560000e+02 : f32
    %2 = vector.broadcast %cst_2 : f32 to vector<1x32xf32>
    %3 = arith.divf %1, %2 : vector<1x32xf32>
    %c0_3 = arith.constant 0 : index
    %c0_4 = arith.constant 0 : index
    %4 = vector.load %arg2[%c0_3, %c0_4] : memref<32x8xf32, #tpu.memory_space<vmem>>, vector<32x8xf32>
    %cst_5 = arith.constant dense<0.000000e+00> : vector<1x8xf32>
    %5 = tpu.matmul %3, %4, %cst_5 {dimension_numbers = #tpu.dot_dimension_numbers<[1], [0], [0], [1], [0, 0, 1, 1], [], []>} : vector<1x32xf32>, vector<32x8xf32>, vector<1x8xf32> -> vector<1x8xf32>
    %cst_6 = arith.constant 0.000000e+00 : f32
    %6 = vector.broadcast %cst_6 : f32 to vector<1x8xf32>
    %7 = arith.maximumf %5, %6 : vector<1x8xf32>
    %c0_7 = arith.constant 0 : index
    %c0_8 = arith.constant 0 : index
    %8 = vector.load %arg3[%c0_7, %c0_8] : memref<8x32xf32, #tpu.memory_space<vmem>>, vector<8x32xf32>
    %cst_9 = arith.constant dense<0.000000e+00> : vector<1x32xf32>
    %9 = tpu.matmul %7, %8, %cst_9 {dimension_numbers = #tpu.dot_dimension_numbers<[1], [0], [0], [1], [0, 0, 1, 1], [], []>} : vector<1x8xf32>, vector<8x32xf32>, vector<1x32xf32> -> vector<1x32xf32>
    %10 = arith.negf %9 : vector<1x32xf32>
    %11 = math.exp %10 : vector<1x32xf32>
    %cst_10 = arith.constant 1.000000e+00 : f32
    %12 = vector.broadcast %cst_10 : f32 to vector<1x32xf32>
    %13 = arith.addf %12, %11 : vector<1x32xf32>
    %14 = arith.divf %12, %13 : vector<1x32xf32>
    %15 = vector.shape_cast %14 : vector<1x32xf32> to vector<1x32x1xf32>
    %16 = vector.broadcast %15 : vector<1x32x1xf32> to vector<1x32x256xf32>
    %17 = arith.mulf %0, %16 : vector<1x32x256xf32>
    %c0_11 = arith.constant 0 : index
    %c0_12 = arith.constant 0 : index
    %c0_13 = arith.constant 0 : index
    %18 = vector.load %arg4[%c0_11, %c0_12, %c0_13] : memref<1x32x256xf32, #tpu.memory_space<vmem>>, vector<1x32x256xf32>
    tpu.vector_store %arg4[%c0_11, %c0_12, %c0_13], %17 {strides = array<i32>} : memref<1x32x256xf32, #tpu.memory_space<vmem>>, vector<1x32x256xf32>,
    return
  }
  func.func @transform_0(%arg0: i32) -> (i32, i32, i32) {
    %c0_i32 = arith.constant 0 : i32
    %c0_i32_0 = arith.constant 0 : i32
    %c0_i32_1 = arith.constant 0 : i32
    return %arg0, %c0_i32, %c0_i32_0 : i32, i32, i32
  }
  func.func @transform_1(%arg0: i32) -> (i32, i32) {
    %c0_i32 = arith.constant 0 : i32
    %c0_i32_0 = arith.constant 0 : i32
    %c0_i32_1 = arith.constant 0 : i32
    return %c0_i32, %c0_i32_0 : i32, i32
  }
  func.func @transform_2(%arg0: i32) -> (i32, i32) {
    %c0_i32 = arith.constant 0 : i32
    %c0_i32_0 = arith.constant 0 : i32
    %c0_i32_1 = arith.constant 0 : i32
    return %c0_i32, %c0_i32_0 : i32, i32
  }
  func.func @transform_3(%arg0: i32) -> (i32, i32, i32) {
    %c0_i32 = arith.constant 0 : i32
    %c0_i32_0 = arith.constant 0 : i32
    %c0_i32_1 = arith.constant 0 : i32
    return %arg0, %c0_i32, %c0_i32_0 : i32, i32, i32
  }
}

</mosaic_0001>

<bundles_post_ra>
// kernel: tpu_custom_call.1
= control target key start
LH: loop header
LB: loop body
LE: loop exit
PB: predicated region body
PF: predicated region fallthrough
CT: control target
= control target key end

     0   :  { %8 = vsyncpa [#allocation3], 0  ;;  %s825_s0 = inlined_call_operand.hbm [shape: f32[2,32,256], index: 0, kind: input, shape index: {}]   ;;  %s826_s1 = inlined_call_operand.vmem [shape: f32[32,8], index: 1, kind: input, shape index: {}]   ;;  %s827_s2 = inlined_call_operand.vmem [shape: f32[8,32], index: 2, kind: input, shape index: {}]   ;;  %s828_s3 = inlined_call_operand.hbm [shape: f32[2,32,256], index: 3, kind: output, shape index: {}]  }
   0x1   :  { %10 = vsyncpa [#allocation3 + $0x1], 0 }
   0x2   :  { %11 = vsyncpa [#allocation4], 0 }
   0x3   :  { %13 = vsyncpa [#allocation4 + $0x1], 0  ;;  %s647_s12 = smov 0   ;;  %s649_s13 = smov 0  }
   0x4   :  { %s651_s14 = smov 0   ;;  %s653_s15 = smov 0  }
   0x5 LB: > { %s668_s16 = sadd.s32 4294967295, %s620_s15   ;;  %s443_s17 = sadd.s32 4294967294, %s620_s15   ;;  %s620_s15 = sphi %s653_s15, %s838_s15   ;;  %s616_s14 = sphi %s651_s14, %s837_s14   ;;  %s612_s13 = sphi %s649_s13, %s836_s13   ;;  %s608_s12 = sphi %s647_s12, %s835_s12  }
   0x6   : > { %s672_s18 = sadd.s32 1, %s620_s15   ;;  %s26_s19 = sadd.s32 1, %s616_s14 }
   0x7   : > { %s23_s20 = ssub.s32 %s620_s15, %s672_s18  ;;  %p33_p0 = scmp.ne.s32.totalorder %s616_s14, %s612_s13 }
   0x8   : > { %p24_p1 = scmp.eq.s32.totalorder %s23_s20, 0  ;;  %p34_p2 = scmp.eq.s32.totalorder %s620_s15, 0 }
   0x9   : > { %p39_p3 = scmp.ne.s32.totalorder %s612_s13, %s608_s12  ;;  %p40_p4 = scmp.eq.s32.totalorder %s668_s16, 0 }
   0xa   : > { %s684_s21 = scalar_select %p24_p1, %s616_s14, %s26_s19  }
   0xb   : > { %p686_p5 = por %p34_p2, %p33_p0  ;;  %p690_p6 = por %p40_p4, %p39_p3 }
   0xc   : > { %p105_p7 = scmp.eq.s32.totalorder %s668_s16, 1  ;;  %p111_p8 = scmp.eq.s32.totalorder %s443_s17, 1 }
   0xd   : > { %p474_p10 = scmp.lt.s32.totalorder %s620_s15, 2  ;;  %s137_s26 = sand.u32 1, %s616_s14  }
   0xe   : > { %p697_p11 = por %p105_p7, %p33_p0  ;;  %p701_p12 = por %p111_p8, %p39_p3 }
   0xf   : > { %s460_s27 = sshll.u32 %s620_s15, 6  ;;  %s446_s28 = sshll.u32 %s137_s26, 6 }
  0x10   : > { %s146_s4 = scalar_lea.hbm %s825_s0, %s460_s27  ;;  %s141_s6 = scalar_lea.vmem [#allocation2], %s446_s28 }
  0x11   : > { %s147_s5 = sshll.u32 %s146_s4, 4  ;;  %s149_s7 = sshll.u32 %s141_s6, 4  ;;  %s148_s5 = int_to_ptr.hbm [resolvable:$true] %s147_s5  ;;  %s150_s7 = int_to_ptr.vmem [resolvable:$true] %s149_s7 }
  0x12   : > { %p712_p13 = pnand %p474_p10, %p686_p5  ;;  %p449_p0 = scmp.ge.s32.totalorder %s620_s15, 1 }
  0x13   : > { %p157_p1 = scmp.lt.s32.totalorder %s620_s15, 3  ;;  %s138_s9 = scalar_lea.sflag [#allocation3], %s137_s26 }
  0x14   : > { %s524_s10 = sshra.s32 %s148_s5, 4  ;;  %p528_p3 = pneg %p712_p13  ;;  %s525_s10 = int_to_ptr.hbm [resolvable:$true] %s524_s10 }
  0x15   : > { %s526_s11 = scalar_lea.hbm %s525_s10, 64  ;;  %s531_s20 = scalar_lea.hbm %s825_s0, 128 }
  0x16   : > { %p527_p2 = scmp.ne.s32.totalorder %s525_s10, %s526_s11  ;;  %p532_p5 = scmp.lt.s32.totalorder %s525_s10, %s825_s0 }
  0x17   : > { %p533_p8 = scmp.lt.s32.totalorder %s531_s20, %s526_s11 }
  0x18   : > { %p529_p4 = pnand %p528_p3, %p527_p2 }
  0x19   : > { %p534_p10 = por %p533_p8, %p532_p5 }
  0x1a   : > { %p530_p7 = pneg %p529_p4 }
  0x1c   : > { %p535_p9 = pnand %p534_p10, %p530_p7 }
  0x1e   : > { %538 = shalt.err (!%p535_p9)
}
  0x1f   : > { %s622_s26 = smov 256   ;;  %s623_s28 = smov 16  }
  0x20   : > { %469 = dma.hbm_to_vmem [thread:$0]  (!%p712_p13), %s148_s5, 1024, %s150_s7, %s138_s9, %s622_s26, %s622_s26, %s623_s28  }
  0x21   : > { %p158_p2 = pnand %p449_p0, %p157_p1 }
  0x22   : > { %s733_s29 = sand.u32 (!%p158_p2), 1, %s612_s13  }
  0x23   : > { %161 = sbr.rel (%p158_p2) target bundleno = 583 (0x247), region = 32  ;;  %s450_s30 = sshll.u32 (!%p158_p2), %s733_s29, 6 }
  0x24   : > { %s164_s4 = scalar_lea.sflag (!%p158_p2), [#allocation3], %s733_s29  ;;  %s167_s6 = scalar_lea.vmem (!%p158_p2), [#allocation2], %s450_s30 }
  0x28   : > { %599 = dma.done.wait (%p690_p6), %s164_s4, 1024  }
  0x29   : > { %601 = vsyncadd (%p690_p6), %s164_s4, 4294966272  ;;  %v743_v0 = vld [vmem:[%s167_s6] sm:$0xff]  ;;  %v745_v1 = vld [vmem:[%s167_s6 + $0x8] sm:$0xff]  ;;  %v624_v14 = vmov 256.0   ;;  %v230_v22 = vlaneseq  ;;  %vm235_vm1 = vcmask 130112   ;;  %vm239_vm2 = vcmask 195712  }
  0x2a   : > { %v747_v2 = vld [vmem:[%s167_s6 + $0x20] sm:$0xff]  ;;  %v199_v3 = vadd.f32 %v745_v1, %v743_v0  ;;  %v751_v4 = vld [vmem:[%s167_s6 + $0x28] sm:$0xff]  ;;  %v755_v6 = vld [vmem:[%s167_s6 + $0x10] sm:$0xff]  ;;  %518 = vrcp.f32 %v624_v14  ;;  %vm243_vm3 = vcmask 261312   ;;  %vm245_vm4 = vcmask 261120   ;;  %s190_s22 = scalar_lea.vmem [#allocation5], %s450_s30 }
  0x2b   : > { %v205_v5 = vadd.f32 %v751_v4, %v747_v2  ;;  %v757_v7 = vld [vmem:[%s167_s6 + $0x18] sm:$0xff]  ;;  %v759_v8 = vld [vmem:[%s167_s6 + $0x30] sm:$0xff]  ;;  %v223_v15 = vld [vmem:[%s826_s1 + $0x8] sm:$0xff]  ;;  %v231_v26 = vand.u32 127, %v230_v22  ;;  %vm270_vm5 = vcmask 64512   ;;  %v315_v46 = vshrl.u32 %v230_v22, 7 }
  0x2c   : > { %200 = vadd.xlane.f32.xlu0 %v199_v3  ;;  %v761_v9 = vld [vmem:[%s167_s6 + $0x38] sm:$0xff]  ;;  %v202_v10 = vadd.f32 %v757_v7, %v755_v6  ;;  %v224_v13 = vld [vmem:[%s826_s1 + $0x10] sm:$0xff]  ;;  %v222_v16 = vld [vmem:[%s826_s1] sm:$0xff]  ;;  %s461_s27 = sshll.u32 %s668_s16, 6  ;;  %s367_s6 = sshll.u32 %s190_s22, 4  ;;  %s368_s6 = int_to_ptr.vmem [resolvable:$true] %s367_s6 }
  0x2d   : > { %206 = vadd.xlane.f32.xlu1 %v205_v5  ;;  %v208_v11 = vadd.f32 %v761_v9, %v759_v8  ;;  %v225_v12 = vld [vmem:[%s826_s1 + $0x18] sm:$0xff]  ;;  %v233_v28 = vadd.s32 4294967288, %v231_v26  ;;  %v237_v29 = vadd.s32 4294967280, %v231_v26  ;;  %v241_v32 = vadd.s32 4294967272, %v231_v26  ;;  %v269_v43 = vld [vmem:[%s827_s2] sm:$0xff]  ;;  %513 = vset.pattern.permute.xlu2 %v315_v46  ;;  %s366_s4 = scalar_lea.hbm %s828_s3, %s461_s27  ;;  %s355_s16 = scalar_lea.sflag [#allocation4], %s733_s29 }
  0x2e   : > { %260 = vmatpush.msra.mxu0 %v225_v12  ;;  %289 = vmatpush.msra.mxu1 %v269_v43  ;;  %v334_v47 = vadd.s32 24, %v315_v46  ;;  %v328_v48 = vadd.s32 16, %v315_v46  ;;  %v322_v3 = vadd.s32 8, %v315_v46  ;;  %s369_s23 = sshll.u32 %s366_s4, 4  ;;  %s574_s9 = scalar_lea.hbm %s828_s3, 128  ;;  %s370_s23 = int_to_ptr.hbm [resolvable:$true] %s369_s23 }
  0x2f   : > { %s568_s30 = sshra.s32 %s370_s23, 4  ;;  %s569_s30 = int_to_ptr.hbm [resolvable:$true] %s568_s30 }
  0x30   : > { %261 = vmatpush.msra.mxu0 %v224_v13  ;;  %v519_v17 = vpop.eup %518  ;;  %516 = vset.pattern.permute.xlu1 %v334_v47  ;;  %s570_s5 = scalar_lea.hbm %s569_s30, 64  ;;  %p575_p0 = scmp.lt.s32.totalorder %s569_s30, %s828_s3 }
  0x31   : > { %v212_v18 = vmul.f32 256.0, %v519_v17  ;;  %vm216_vm0 = vweird.f32 %v519_v17  ;;  %515 = vset.pattern.permute.xlu0 %v328_v48  ;;  %p571_p6 = scmp.ne.s32.totalorder %s569_s30, %s570_s5  ;;  %p576_p1 = scmp.lt.s32.totalorder %s574_s9, %s570_s5 }
  0x32   : > { %262 = vmatpush.msra.mxu0 %v223_v15 }
  0x33   : > { %v213_v19 = vsub.f32 1.0, %v212_v18  ;;  %p572_p9 = pnand %p571_p6, %p697_p11  ;;  %p577_p3 = por %p576_p1, %p575_p0 }
  0x34   : > { %203 = vadd.xlane.f32.xlu0 %v202_v10  ;;  %263 = vmatpush.msra.mxu0 %v222_v16 }
  0x35   : > { %209 = vadd.xlane.f32.xlu1 %v208_v11  ;;  %v214_v20 = vmul.f32 %v519_v17, %v213_v19  ;;  %p573_p13 = pneg %p572_p9 }
  0x37   : > { %v215_v21 = vadd.f32 %v519_v17, %v214_v20  ;;  %p578_p4 = pnand %p577_p3, %p573_p13 }
  0x39   : > { %v217_v25 = vsel %vm216_vm0, %v519_v17, %v215_v21 }
  0x9f   : > { %v201_v23 = vpop.xlane.xlu0 %200 }
  0xa0   : > { %v207_v24 = vpop.xlane.xlu1 %206  ;;  %v218_v27 = vmul.f32 %v217_v25, %v201_v23 }
  0xa1   : > { %v220_v30 = vmul.f32 %v217_v25, %v207_v24 }
  0xa2   : > { %v232_v36 = vperm.slane %v218_v27, %v231_v26 }
  0xa3   : > { %v238_v38 = vperm.slane %v220_v30, %v237_v29 }
  0xa7   : > { %v204_v31 = vpop.xlane.xlu0 %203 }
  0xa8   : > { %v219_v33 = vmul.f32 %v217_v25, %v204_v31  ;;  %v210_v34 = vpop.xlane.xlu1 %209 }
  0xa9   : > { %v221_v35 = vmul.f32 %v217_v25, %v210_v34 }
  0xaa   : > { %v234_v37 = vperm.slane %v219_v33, %v233_v28 }
  0xab   : > { %v242_v39 = vperm.slane %v221_v35, %v241_v32 }
  0xac   : > { %v236_v40 = vsel %vm235_vm1, %v234_v37, %v232_v36 }
  0xad   : > { %v240_v41 = vsel %vm239_vm2, %v238_v38, %v236_v40 }
  0xae   : > { %v244_v42 = vsel %vm243_vm3, %v242_v39, %v240_v41 }
  0xaf   : > { %452 = vmatmul.msk.f32.vlgmr.msra.gmra.mxu0 %vm245_vm4, %v244_v42 }
 0x12c   : > { %v265_v44 = vpop.f32.mrf.mxu0 }
 0x12d   : > { %v268_v45 = vmax.f32 %v265_v44, 0.0 }
 0x12f   : > { %453 = vmatmul.msk.f32.vlgmr.msra.gmra.mxu1 %vm270_vm5, %v268_v45 }
 0x1ac   : > { %v291_v49 = vpop.f32.mrf.mxu1 }
 0x1ad   : > { %v454_v50 = vmul.f32 -1.442695, %v291_v49 }
 0x1af   : > { %520 = vpow2.f32 %v454_v50 }
 0x1b5   : > { %v521_v51 = vpop.eup %520 }
 0x1b6   : > { %v297_v52 = vadd.f32 1.0, %v521_v51 }
 0x1b8   : > { %522 = vrcp.f32 %v297_v52  ;;  %v309_v56 = vand.u32 2147483648, %v297_v52  ;;  %v307_v58 = vand.u32 2147483647, %v297_v52  ;;  %vm303_vm7 = vweird.f32 %v297_v52 }
 0x1ba   : > { %v310_v60 = vor.u32 1.1754944e-38, %v309_v56  ;;  %vm308_vm9 = vcmp.eq.f32.partialorder %v307_v58, 8.507059e+37 }
 0x1be   : > { %v523_v53 = vpop.eup %522 }
 0x1bf   : > { %v299_v54 = vmul.f32 %v523_v53, %v297_v52  ;;  %vm304_vm6 = vweird.f32 %v523_v53 }
 0x1c0   : > { %vm305_vm8 = vmor %vm303_vm7, %vm304_vm6 }
 0x1c1   : > { %v300_v55 = vsub.f32 1.0, %v299_v54 }
 0x1c3   : > { %v301_v57 = vmul.f32 %v523_v53, %v300_v55 }
 0x1c5   : > { %v302_v59 = vadd.f32 %v523_v53, %v301_v57 }
 0x1c7   : > { %v306_v61 = vsel %vm305_vm8, %v523_v53, %v302_v59 }
 0x1c8   : > { %v311_v62 = vsel %vm308_vm9, %v310_v60, %v306_v61 }
 0x1c9   : > { %v313_v63 = vperm.slane %v311_v62, 0 }
 0x1cb   : > { %336 = vperm.xlu1 %516, %v313_v63   ;;  %330 = vperm.xlu0 %515, %v313_v63  }
 0x1cc   : > { %318 = vperm.xlu2 %513, %v313_v63  }
 0x1d3   : > { %517 = vset.pattern.permute.xlu0 %v334_v47 }
 0x1d4   : > { %514 = vset.pattern.permute.xlu2 %v322_v3 }
 0x1dc   : > { %324 = vperm.xlu2 %514, %v313_v63  }
 0x226   : > { %v319_v5 = vpop.permute.xlu2 %318 }
 0x227   : > { %v338_v10 = vmul.f32 %v319_v5, %v743_v0  ;;  %v339_v11 = vmul.f32 %v319_v5, %v745_v1 }
 0x229   : > { %346 = vst [vmem:[%s190_s22] sm:$0xff] %v338_v10 }
 0x22a   : > { %347 = vst [vmem:[%s190_s22 + $0x8] sm:$0xff] %v339_v11 }
 0x236   : > { %v325_v12 = vpop.permute.xlu2 %324 }
 0x237   : > { %v340_v13 = vmul.f32 %v325_v12, %v755_v6  ;;  %v341_v14 = vmul.f32 %v325_v12, %v757_v7 }
 0x239   : > { %348 = vst [vmem:[%s190_s22 + $0x10] sm:$0xff] %v340_v13 }
 0x23a   : > { %349 = vst [vmem:[%s190_s22 + $0x18] sm:$0xff] %v341_v14 }
 0x23d   : > { %v337_v0 = vpop.permute.xlu1 %336  ;;  %v331_v1 = vpop.permute.xlu0 %330 }
 0x23e   : > { %v344_v15 = vmul.f32 %v337_v0, %v759_v8  ;;  %v345_v16 = vmul.f32 %v337_v0, %v761_v9  ;;  %v342_v6 = vmul.f32 %v331_v1, %v747_v2  ;;  %v343_v7 = vmul.f32 %v331_v1, %v751_v4 }
 0x240   : > { %352 = vst [vmem:[%s190_s22 + $0x30] sm:$0xff] %v344_v15 }
 0x241   : > { %353 = vst [vmem:[%s190_s22 + $0x38] sm:$0xff] %v345_v16 }
 0x242   : > { %350 = vst [vmem:[%s190_s22 + $0x20] sm:$0xff] %v342_v6 }
 0x243   : > { %351 = vst [vmem:[%s190_s22 + $0x28] sm:$0xff] %v343_v7 }
 0x244   : > { %581 = shalt.err (!%p578_p4)
}
 0x245   : > { %s625_s29 = smov 256   ;;  %s626_s17 = smov 16  }
 0x246   : > { %464 = dma.vmem_to_hbm [thread:$0]  (%p697_p11), %s368_s6, 1024, %s370_s23, %s355_s16, %s625_s29, %s625_s29, %s626_s17  }
 0x247 PF: > { %s384_s19 = sand.u32 1, %s608_s12   ;;  %p834_p7 = scmp.ge.s32.totalorder %s620_s15, 2 }
 0x248   : > { %s385_s20 = scalar_lea.sflag [#allocation4], %s384_s19 }
 0x249   : > { %p471_p5 = pnand %p834_p7, %p701_p12 }
 0x24b   : > { %p472_p8 = pneg %p471_p5 }
 0x24d   : > { %603 = dma.done.wait (%p472_p8), %s385_s20, 1024  }
 0x24e   : > { %605 = vsyncadd (%p472_p8), %s385_s20, 4294966272  ;;  %p16_p10 = scmp.ge.s32.totalorder %s672_s18, 4   ;;  %s835_s12 = smov %s612_s13 }
 0x24f   : > { %s836_s13 = smov %s616_s14  ;;  %s837_s14 = smov %s684_s21 }
 0x250   : > { %s838_s15 = smov %s672_s18  ;;  %18 = sbr.rel (!%p16_p10) target bundleno = 5 (0x5), region = 77 }
 0x255   :  { %391 = vsyncpa [#allocation3], 1 }
 0x256   :  { %393 = vsyncpa [#allocation3 + $0x1], 1 }
 0x257   :  { %394 = vsyncpa [#allocation4], 1 }
 0x258   :  { %396 = vsyncpa [#allocation4 + $0x1], 1 }

</bundles_post_ra>
